<compile_context>
chip_gen: v6e
topology: v6e:2x2x1
jax: 0.10.0
libtpu: 0.0.40
codegen_flags: <defaults>
</compile_context>

<pallas_src>
import math
from functools import partial
from typing import NamedTuple

import jax
import jax.numpy as jnp
from jax import lax
from jax.experimental import pallas as pl
from jax.experimental.pallas import tpu as pltpu


def _round_up(x, m):
    return (x + m - 1) // m * m


def _cdiv(a, b):
    return (a + b - 1) // b


def _gelu(x, approximate):
    if approximate:
        # tanh-approx GELU (EUP path; cheaper on v5e). Numerics differ slightly
        # from PyTorch's default exact GELU.
        return jax.nn.gelu(x, approximate=True)
    # PyTorch nn.GELU() default: exact erf-based GELU.
    return 0.5 * x * (1.0 + lax.erf(x * (1.0 / math.sqrt(2.0))))


# -----------------------------------------------------------------------------
# Kernel
# -----------------------------------------------------------------------------
def geglu_mlp_kernel(x_ref, wg_ref, bg_ref, w2_ref, b2_ref, o_ref, acc_ref, *,
                     hidden_chunk, approximate_gelu):
    """One (row-tile, hidden-chunk) grid step of the fused GEGLU MLP.

    Grid = (row_tiles, hidden_chunks); the hidden-chunk axis is the inner reduction.

      x_ref  : (TM, C_in)        activation row tile (input dtype; cast in VMEM)
      wg_ref : (C_in, 2*Hc)      fused gate weight chunk  [W11_k | W12_k]
      bg_ref : (1, 2*Hc)   f32   fused gate bias chunk    [b11_k | b12_k]
      w2_ref : (Hc, C_out)       output-projection weight chunk (rows k*Hc:(k+1)*Hc)
      b2_ref : (1, C_out)  f32   output-projection bias
      o_ref  : (TM, C_out)       output row tile (written on the last chunk only)
      acc_ref: (TM, C_out) f32   VMEM accumulator, persists across the chunk axis
    """
    k = pl.program_id(1)

    @pl.when(k == 0)
    def _():
        acc_ref[...] = jnp.zeros_like(acc_ref)

    # Cast the activation tile in VMEM (HBM traffic stays at the input dtype).
    x = x_ref[...].astype(wg_ref.dtype)

    # Single fused gate GEMM for this hidden chunk; f32 accumulation on the MXU.
    g = jnp.dot(x, wg_ref[...], preferred_element_type=jnp.float32) + bg_ref[...]
    h1 = g[:, :hidden_chunk]                 # static, lane-aligned split
    h2 = g[:, hidden_chunk:]
    h = _gelu(h1, approximate_gelu) * h2     # GEGLU gate in f32
    # drop = 0.0 -> Dropout is the identity; nothing to do.

    acc_ref[...] += jnp.dot(h.astype(w2_ref.dtype), w2_ref[...],
                            preferred_element_type=jnp.float32)

    @pl.when(k == pl.num_programs(1) - 1)
    def _():
        o_ref[...] = (acc_ref[...] + b2_ref[...]).astype(o_ref.dtype)


# -----------------------------------------------------------------------------
# VMEM budgeting
# -----------------------------------------------------------------------------
def _vmem_budget_bytes():
    # ~85% of physical per-core VMEM (v5e/v6e: 128 MiB, v7x: 64 MiB); leaves
    # headroom for Mosaic internal scratch and pipeline bookkeeping.
    try:
        cap = int(pltpu.get_tpu_info().vmem_capacity_bytes)
    except Exception:
        cap = 128 << 20
    return int(cap * 0.85)


def _vmem_needed_bytes(TM, C_in, C_out, Hc, nk, w_isz, x_isz, o_isz,
                       single_buffer_weights):
    """Conservative resident-footprint estimate (counts live f32 intermediates)."""
    cin = _round_up(C_in, 128)
    cout = _round_up(C_out, 128)
    wbuf = 1 if (single_buffer_weights and nk == 1) else 2
    weights = (wbuf * ((cin * 2 * Hc + Hc * cout) * w_isz + 2 * Hc * 4)
               + 2 * cout * 4)
    io = 2 * TM * cin * x_isz + 2 * TM * cout * o_isz     # double-buffered x / out
    acc = TM * cout * 4                                   # f32 accumulator scratch
    inter = TM * (cin * w_isz        # x cast
                  + 2 * Hc * 4       # gate slab g
                  + Hc * 4           # gelu(h1) * h2
                  + Hc * w_isz       # h cast for the 2nd GEMM
                  + cout * 4)        # 2nd GEMM result before accumulation
    return weights + io + acc + inter + (4 << 20)         # ~4 MiB headroom


def _auto_hidden_chunk(Hp, tile_rows, C_in, C_out, w_isz):
    budget = _vmem_budget_bytes()
    Hc = min(Hp, 2048)
    while Hc > 256:
        if _vmem_needed_bytes(tile_rows, C_in, C_out, Hc, _cdiv(Hp, Hc),
                              w_isz, 4, 4, True) <= budget:
            break
        Hc = max(256, _round_up(Hc // 2, 256))
    return Hc


# -----------------------------------------------------------------------------
# One-time parameter preparation (hoisted out of the per-call path)
# -----------------------------------------------------------------------------
class PreparedGEGLU(NamedTuple):
    wg: jax.Array        # (C_in, num_chunks * 2 * Hc), chunk-interleaved [W11_k | W12_k]
    bg: jax.Array        # (1, num_chunks * 2 * Hc)  f32
    w2: jax.Array        # (num_chunks * Hc, C_out)
    b2: jax.Array        # (1, C_out)                f32
    c_in: int
    c_out: int
    hidden_chunk: int
    num_chunks: int
    gelu_approximate: bool


def prepare_params(params, *, compute_dtype=jnp.float32, tile_rows=1024,
                   hidden_chunk=None, gelu_approximate=False):
    """Build fused / zero-padded / (optionally bf16) weights ONCE.

    Every forward then reads these straight from HBM with no per-call XLA
    pad/cast passes. Zero padding is exact (padded columns/rows contribute 0).
    """
    w11, b11, w12, b12, w2, b2 = params
    C_in, hidden = w11.shape
    C_out = w2.shape[1]
    compute_dtype = jnp.dtype(compute_dtype)

    Hp = _round_up(hidden, 128)
    if hidden_chunk is None:
        hidden_chunk = _auto_hidden_chunk(Hp, tile_rows, C_in, C_out,
                                          compute_dtype.itemsize)
    Hc = min(_round_up(hidden_chunk, 128), Hp)
    nk = _cdiv(Hp, Hc)
    Htot = nk * Hc

    def pad_gate(w, b):
        wp = jnp.zeros((C_in, Htot), compute_dtype).at[:, :hidden].set(
            w.astype(compute_dtype))
        bp = jnp.zeros((Htot,), jnp.float32).at[:hidden].set(b.astype(jnp.float32))
        return wp, bp

    w11p, b11p = pad_gate(w11, b11)
    w12p, b12p = pad_gate(w12, b12)

    # Chunk-interleaved fused gate weight: chunk k -> [W11[:, k*Hc:(k+1)*Hc] | W12[...]]
    wg = jnp.stack([w11p.reshape(C_in, nk, Hc), w12p.reshape(C_in, nk, Hc)],
                   axis=2).reshape(C_in, nk * 2 * Hc)
    bg = jnp.stack([b11p.reshape(nk, Hc), b12p.reshape(nk, Hc)],
                   axis=1).reshape(1, nk * 2 * Hc)

    w2p = jnp.zeros((Htot, C_out), compute_dtype).at[:hidden, :].set(
        w2.astype(compute_dtype))
    b2p = b2.astype(jnp.float32).reshape(1, C_out)

    return PreparedGEGLU(wg, bg, w2p, b2p, int(C_in), int(C_out), int(Hc),
                         int(nk), bool(gelu_approximate))


# -----------------------------------------------------------------------------
# Forward
# -----------------------------------------------------------------------------
def mlp_geglu_forward(x, prepared: PreparedGEGLU, *, tile_rows=1024):
    """x: (..., C_in) -> (..., C_out). Leading dims are flattened into rows."""
    *lead, C = x.shape
    assert C == prepared.c_in, "input feature dim mismatch"
    C_in, C_out = prepared.c_in, prepared.c_out
    Hc, nk = prepared.hidden_chunk, prepared.num_chunks
    N = math.prod(lead) if lead else 1

    x_dt = jnp.dtype(x.dtype)
    w_dt = jnp.dtype(prepared.wg.dtype)
    o_dt = x_dt                              # keep the module's output dtype

    # Row tile: largest multiple of the sublane quantum that fits in N. The ragged
    # trailing tile is handled by the pl.cdiv grid + masked stores (no N padding).
    sub = max(8, 32 // max(1, x_dt.itemsize))
    TM = _round_up(min(int(tile_rows), max(N, 1)), sub)
    if N >= sub:
        TM = min(TM, (N // sub) * sub)
    else:
        TM = N                               # block == full (tiny) row dim

    budget = _vmem_budget_bytes()
    while (_vmem_needed_bytes(TM, C_in, C_out, Hc, nk, w_dt.itemsize,
                              x_dt.itemsize, o_dt.itemsize, True) > budget
           and TM > 256):
        TM = max(256, ((TM // 2) // sub) * sub)

    needed = _vmem_needed_bytes(TM, C_in, C_out, Hc, nk, w_dt.itemsize,
                                x_dt.itemsize, o_dt.itemsize, True)
    vmem_limit = int(min(budget, max(32 << 20, needed)))

    grid = (pl.cdiv(N, TM), nk)
    x2d = x.reshape(N, C_in)                 # metadata only: no pad, no cast

    kernel = partial(geglu_mlp_kernel, hidden_chunk=Hc,
                     approximate_gelu=prepared.gelu_approximate)

    def run(single_buffer_weights):
        def wspec(shape, index_map, constant):
            # Constant-index weight blocks: single-buffer them (double-buffering a
            # block that never changes only wastes VMEM).
            if constant and single_buffer_weights:
                return pl.BlockSpec(shape, index_map,
                                    pipeline_mode=pl.Buffered(1))
            return pl.BlockSpec(shape, index_map)

        const_gate = (nk == 1)               # chunked weights cycle -> keep 2 buffers
        in_specs = [
            pl.BlockSpec((TM, C_in), lambda i, k: (i, 0)),            # x rows
            wspec((C_in, 2 * Hc), lambda i, k: (0, k), const_gate),   # fused gate W chunk
            wspec((1, 2 * Hc), lambda i, k: (0, k), const_gate),      # fused gate b chunk
            wspec((Hc, C_out), lambda i, k: (k, 0), const_gate),      # W2 chunk
            wspec((1, C_out), lambda i, k: (0, 0), True),             # b2
        ]
        return pl.pallas_call(
            kernel,
            out_shape=jax.ShapeDtypeStruct((N, C_out), o_dt),
            grid_spec=pltpu.PrefetchScalarGridSpec(
                num_scalar_prefetch=0,
                grid=grid,
                in_specs=in_specs,
                out_specs=pl.BlockSpec((TM, C_out), lambda i, k: (i, 0)),
                scratch_shapes=[pltpu.VMEM((TM, C_out), jnp.float32)],
            ),
            compiler_params=pltpu.CompilerParams(
                # rows -> megacore/2-TC parallel (v7x); hidden chunks -> reduction.
                dimension_semantics=("parallel", "arbitrary"),
                vmem_limit_bytes=vmem_limit),
        )(x2d, prepared.wg, prepared.bg, prepared.w2, prepared.b2)

    try:
        out2d = run(single_buffer_weights=True)
    except Exception:
        # Fallback if pl.Buffered(1) is rejected by this Pallas/Mosaic version.
        out2d = run(single_buffer_weights=False)

    return out2d.reshape(*lead, C_out)


# -----------------------------------------------------------------------------
# Parameter init + reference (plain JAX) for testing
# -----------------------------------------------------------------------------
def init_params(key, in_features, hidden_features, out_features, dtype=jnp.float32):
    """Matches the PyTorch module's parameter shapes, stored transposed (in, out)."""
    ks = jax.random.split(key, 6)

    def lin(kw, kb, fan_in, fan_out):
        bound = 1.0 / math.sqrt(fan_in)
        w = jax.random.uniform(kw, (fan_in, fan_out), dtype, -bound, bound)
        b = jax.random.uniform(kb, (fan_out,), dtype, -bound, bound)
        return w, b

    w11, b11 = lin(ks[0], ks[1], in_features, hidden_features)
    w12, b12 = lin(ks[2], ks[3], in_features, hidden_features)
    w2, b2 = lin(ks[4], ks[5], hidden_features, out_features)
    return (w11, b11, w12, b12, w2, b2)


def reference_forward(x, params, *, approximate_gelu=False):
    """Plain-JAX (f32) reference matching the PyTorch forward."""
    w11, b11, w12, b12, w2, b2 = params
    h = _gelu(x @ w11 + b11, approximate_gelu) * (x @ w12 + b12)
    return h @ w2 + b2


if __name__ == "__main__":
    key = jax.random.PRNGKey(0)
    k_x, k_x2, k_p, k_p2, k_x3 = jax.random.split(key, 5)

    in_features, hidden_features, out_features = 32, 64, 32
    params = init_params(k_p, in_features, hidden_features, out_features)

    # Fused / padded weights built ONCE (hoisted out of the per-call path).
    prep_f32 = prepare_params(params, compute_dtype=jnp.float32)
    prep_bf16 = prepare_params(params, compute_dtype=jnp.bfloat16)

    # --- test 1: f32, tile-friendly shape -------------------------------------
    B, D, H, W = 2, 2, 4, 4
    x = jax.random.normal(k_x, (B, D, H, W, in_features), dtype=jnp.float32)
    out = jax.block_until_ready(mlp_geglu_forward(x, prep_f32))
    ref = reference_forward(x, params)
    assert out.shape == (B, D, H, W, out_features)
    assert out.dtype == x.dtype
    assert jnp.allclose(out, ref, atol=1e-4, rtol=1e-4), "f32 mismatch vs reference"

    # --- test 2: ragged row count (pl.cdiv grid + masked stores, no N padding) -
    x2 = jax.random.normal(k_x2, (1, 3, 5, 7, in_features), dtype=jnp.float32)
    out2 = jax.block_until_ready(mlp_geglu_forward(x2, prep_f32))
    ref2 = reference_forward(x2, params)
    assert out2.shape == (1, 3, 5, 7, out_features)
    assert jnp.allclose(out2, ref2, atol=1e-4, rtol=1e-4), "ragged-N mismatch"

    # --- test 3: bf16 weights/compute, f32 in & out (cast happens in VMEM) -----
    out_bf16 = jax.block_until_ready(mlp_geglu_forward(x, prep_bf16))
    assert out_bf16.shape == (B, D, H, W, out_features)
    assert out_bf16.dtype == jnp.float32
    assert jnp.all(jnp.isfinite(out_bf16))
    assert jnp.allclose(out_bf16, ref, atol=1e-1, rtol=1e-1), "bf16 mismatch"

    # --- test 4: multi-chunk hidden reduction path (f32 accumulator) -----------
    hidden2 = 320
    params2 = init_params(k_p2, in_features, hidden2, out_features)
    prep_chunked = prepare_params(params2, compute_dtype=jnp.float32,
                                  hidden_chunk=128)        # -> 3 chunks of 128
    assert prep_chunked.num_chunks == 3
    x3 = jax.random.normal(k_x3, (2, 1, 3, 4, in_features), dtype=jnp.float32)
    out3 = jax.block_until_ready(mlp_geglu_forward(x3, prep_chunked))
    ref3 = reference_forward(x3, params2)
    assert out3.shape == (2, 1, 3, 4, out_features)
    assert jnp.allclose(out3, ref3, atol=1e-4, rtol=1e-4), "chunked-hidden mismatch"

    # TODO(synk): Dropout with p > 0 (training mode) would need pltpu.prng_* in-kernel;
    # the module default p=0.0 is an identity, which is what is implemented.
    print("KERNEL_OK")
</pallas_src>

<mosaic_0001>
module attributes {stable_mosaic.version = 11 : i64} {
  func.func @geglu_mlp_kernel(%arg0: i32, %arg1: i32, %arg2: memref<64x32xf32, #tpu.memory_space<vmem>>, %arg3: memref<32x256xf32, #tpu.memory_space<vmem>>, %arg4: memref<1x256xf32, #tpu.memory_space<vmem>>, %arg5: memref<128x32xf32, #tpu.memory_space<vmem>>, %arg6: memref<1x32xf32, #tpu.memory_space<vmem>>, %arg7: memref<64x32xf32, #tpu.memory_space<vmem>>, %arg8: memref<64x32xf32, #tpu.memory_space<vmem>>) attributes {dimension_semantics = [#tpu.dimension_semantics<parallel>, #tpu.dimension_semantics<arbitrary>], iteration_bounds = array<i64: 1, 1>, scalar_prefetch = 0 : i64, scratch_operands = 1 : i64, tpu.core_type = #tpu.core_type<tc>, window_params = [{transform_indices = @transform_0, window_bounds = array<i64: 64, 32>}, {pipeline_mode = #tpu.pipeline_mode<synchronous>, transform_indices = @transform_1, window_bounds = array<i64: 32, 256>}, {pipeline_mode = #tpu.pipeline_mode<synchronous>, transform_indices = @transform_2, window_bounds = array<i64: 1, 256>}, {pipeline_mode = #tpu.pipeline_mode<synchronous>, transform_indices = @transform_3, window_bounds = array<i64: 128, 32>}, {pipeline_mode = #tpu.pipeline_mode<synchronous>, transform_indices = @transform_4, window_bounds = array<i64: 1, 32>}, {transform_indices = @transform_5, window_bounds = array<i64: 64, 32>}]} {
    %c0_i32 = arith.constant 0 : i32
    %0 = arith.cmpi eq, %arg1, %c0_i32 : i32
    %1 = arith.extui %0 : i1 to i32
    %c0_i32_0 = arith.constant 0 : i32
    %2 = arith.cmpi ne, %1, %c0_i32_0 : i32
    scf.if %2 {
      %cst_18 = arith.constant 0.000000e+00 : f32
      %28 = vector.broadcast %cst_18 : f32 to vector<64x32xf32>
      %c0_19 = arith.constant 0 : index
      %c0_20 = arith.constant 0 : index
      %29 = vector.load %arg8[%c0_19, %c0_20] : memref<64x32xf32, #tpu.memory_space<vmem>>, vector<64x32xf32>
      tpu.vector_store %arg8[%c0_19, %c0_20], %28 {strides = array<i32>} : memref<64x32xf32, #tpu.memory_space<vmem>>, vector<64x32xf32>,
    } else {
    }
    %c0 = arith.constant 0 : index
    %c0_1 = arith.constant 0 : index
    %3 = vector.load %arg2[%c0, %c0_1] : memref<64x32xf32, #tpu.memory_space<vmem>>, vector<64x32xf32>
    %c0_2 = arith.constant 0 : index
    %c0_3 = arith.constant 0 : index
    %4 = vector.load %arg3[%c0_2, %c0_3] : memref<32x256xf32, #tpu.memory_space<vmem>>, vector<32x256xf32>
    %cst = arith.constant dense<0.000000e+00> : vector<64x256xf32>
    %5 = tpu.matmul %3, %4, %cst {dimension_numbers = #tpu.dot_dimension_numbers<[1], [0], [0], [1], [0, 0, 1, 1], [], []>} : vector<64x32xf32>, vector<32x256xf32>, vector<64x256xf32> -> vector<64x256xf32>
    %c0_4 = arith.constant 0 : index
    %c0_5 = arith.constant 0 : index
    %6 = vector.load %arg4[%c0_4, %c0_5] : memref<1x256xf32, #tpu.memory_space<vmem>>, vector<1x256xf32>
    %7 = vector.broadcast %6 : vector<1x256xf32> to vector<64x256xf32>
    %8 = arith.addf %5, %7 : vector<64x256xf32>
    %9 = vector.extract_strided_slice %8 {offsets = [0, 0], sizes = [64, 128], strides = [1, 1]} : vector<64x256xf32> to vector<64x128xf32>
    %10 = vector.extract_strided_slice %8 {offsets = [0, 128], sizes = [64, 128], strides = [1, 1]} : vector<64x256xf32> to vector<64x128xf32>
    %cst_6 = arith.constant 5.000000e-01 : f32
    %11 = vector.broadcast %cst_6 : f32 to vector<64x128xf32>
    %12 = arith.mulf %11, %9 : vector<64x128xf32>
    %cst_7 = arith.constant 0.707106769 : f32
    %13 = vector.broadcast %cst_7 : f32 to vector<64x128xf32>
    %14 = arith.mulf %9, %13 : vector<64x128xf32>
    %15 = math.erf %14 : vector<64x128xf32>
    %cst_8 = arith.constant 1.000000e+00 : f32
    %16 = vector.broadcast %cst_8 : f32 to vector<64x128xf32>
    %17 = arith.addf %16, %15 : vector<64x128xf32>
    %18 = arith.mulf %12, %17 : vector<64x128xf32>
    %19 = arith.mulf %18, %10 : vector<64x128xf32>
    %c0_9 = arith.constant 0 : index
    %c0_10 = arith.constant 0 : index
    %20 = vector.load %arg8[%c0_9, %c0_10] : memref<64x32xf32, #tpu.memory_space<vmem>>, vector<64x32xf32>
    %c0_11 = arith.constant 0 : index
    %c0_12 = arith.constant 0 : index
    %21 = vector.load %arg5[%c0_11, %c0_12] : memref<128x32xf32, #tpu.memory_space<vmem>>, vector<128x32xf32>
    %cst_13 = arith.constant dense<0.000000e+00> : vector<64x32xf32>
    %22 = tpu.matmul %19, %21, %cst_13 {dimension_numbers = #tpu.dot_dimension_numbers<[1], [0], [0], [1], [0, 0, 1, 1], [], []>} : vector<64x128xf32>, vector<128x32xf32>, vector<64x32xf32> -> vector<64x32xf32>
    %23 = arith.addf %20, %22 : vector<64x32xf32>
    %c0_14 = arith.constant 0 : index
    %c0_15 = arith.constant 0 : index
    %24 = vector.load %arg8[%c0_14, %c0_15] : memref<64x32xf32, #tpu.memory_space<vmem>>, vector<64x32xf32>
    tpu.vector_store %arg8[%c0_14, %c0_15], %23 {strides = array<i32>} : memref<64x32xf32, #tpu.memory_space<vmem>>, vector<64x32xf32>,
    %c0_i32_16 = arith.constant 0 : i32
    %25 = arith.cmpi eq, %arg1, %c0_i32_16 : i32
    %26 = arith.extui %25 : i1 to i32
    %c0_i32_17 = arith.constant 0 : i32
    %27 = arith.cmpi ne, %26, %c0_i32_17 : i32
    scf.if %27 {
      %c0_18 = arith.constant 0 : index
      %c0_19 = arith.constant 0 : index
      %28 = vector.load %arg8[%c0_18, %c0_19] : memref<64x32xf32, #tpu.memory_space<vmem>>, vector<64x32xf32>
      %c0_20 = arith.constant 0 : index
      %c0_21 = arith.constant 0 : index
      %29 = vector.load %arg6[%c0_20, %c0_21] : memref<1x32xf32, #tpu.memory_space<vmem>>, vector<1x32xf32>
      %30 = vector.broadcast %29 : vector<1x32xf32> to vector<64x32xf32>
      %31 = arith.addf %28, %30 : vector<64x32xf32>
      %c0_22 = arith.constant 0 : index
      %c0_23 = arith.constant 0 : index
      %32 = vector.load %arg7[%c0_22, %c0_23] : memref<64x32xf32, #tpu.memory_space<vmem>>, vector<64x32xf32>
      tpu.vector_store %arg7[%c0_22, %c0_23], %31 {strides = array<i32>} : memref<64x32xf32, #tpu.memory_space<vmem>>, vector<64x32xf32>,
    } else {
    }
    return
  }
  func.func @transform_0(%arg0: i32, %arg1: i32) -> (i32, i32) {
    %c0_i32 = arith.constant 0 : i32
    %c0_i32_0 = arith.constant 0 : i32
    return %arg0, %c0_i32 : i32, i32
  }
  func.func @transform_1(%arg0: i32, %arg1: i32) -> (i32, i32) {
    %c0_i32 = arith.constant 0 : i32
    %c0_i32_0 = arith.constant 0 : i32
    return %c0_i32, %arg1 : i32, i32
  }
  func.func @transform_2(%arg0: i32, %arg1: i32) -> (i32, i32) {
    %c0_i32 = arith.constant 0 : i32
    %c0_i32_0 = arith.constant 0 : i32
    return %c0_i32, %arg1 : i32, i32
  }
  func.func @transform_3(%arg0: i32, %arg1: i32) -> (i32, i32) {
    %c0_i32 = arith.constant 0 : i32
    %c0_i32_0 = arith.constant 0 : i32
    return %arg1, %c0_i32 : i32, i32
  }
  func.func @transform_4(%arg0: i32, %arg1: i32) -> (i32, i32) {
    %c0_i32 = arith.constant 0 : i32
    %c0_i32_0 = arith.constant 0 : i32
    %c0_i32_1 = arith.constant 0 : i32
    return %c0_i32, %c0_i32_0 : i32, i32
  }
  func.func @transform_5(%arg0: i32, %arg1: i32) -> (i32, i32) {
    %c0_i32 = arith.constant 0 : i32
    %c0_i32_0 = arith.constant 0 : i32
    return %arg0, %c0_i32 : i32, i32
  }
}

module attributes {stable_mosaic.version = 11 : i64} {
  func.func @geglu_mlp_kernel(%arg0: i32, %arg1: i32, %arg2: memref<64x32xf32, #tpu.memory_space<vmem>>, %arg3: memref<32x256xf32, #tpu.memory_space<vmem>>, %arg4: memref<1x256xf32, #tpu.memory_space<vmem>>, %arg5: memref<128x32xf32, #tpu.memory_space<vmem>>, %arg6: memref<1x32xf32, #tpu.memory_space<vmem>>, %arg7: memref<64x32xf32, #tpu.memory_space<vmem>>, %arg8: memref<64x32xf32, #tpu.memory_space<vmem>>) attributes {dimension_semantics = [#tpu.dimension_semantics<parallel>, #tpu.dimension_semantics<arbitrary>], iteration_bounds = array<i64: 1, 1>, scalar_prefetch = 0 : i64, scratch_operands = 1 : i64, tpu.core_type = #tpu.core_type<tc>, window_params = [{transform_indices = @transform_0, window_bounds = array<i64: 64, 32>}, {transform_indices = @transform_1, window_bounds = array<i64: 32, 256>}, {transform_indices = @transform_2, window_bounds = array<i64: 1, 256>}, {transform_indices = @transform_3, window_bounds = array<i64: 128, 32>}, {pipeline_mode = #tpu.pipeline_mode<synchronous>, transform_indices = @transform_4, window_bounds = array<i64: 1, 32>}, {transform_indices = @transform_5, window_bounds = array<i64: 64, 32>}]} {
    %c0_i32 = arith.constant 0 : i32
    %0 = arith.cmpi eq, %arg1, %c0_i32 : i32
    %1 = arith.extui %0 : i1 to i32
    %c0_i32_0 = arith.constant 0 : i32
    %2 = arith.cmpi ne, %1, %c0_i32_0 : i32
    scf.if %2 {
      %cst_18 = arith.constant 0.000000e+00 : f32
      %28 = vector.broadcast %cst_18 : f32 to vector<64x32xf32>
      %c0_19 = arith.constant 0 : index
      %c0_20 = arith.constant 0 : index
      %29 = vector.load %arg8[%c0_19, %c0_20] : memref<64x32xf32, #tpu.memory_space<vmem>>, vector<64x32xf32>
      tpu.vector_store %arg8[%c0_19, %c0_20], %28 {strides = array<i32>} : memref<64x32xf32, #tpu.memory_space<vmem>>, vector<64x32xf32>,
    } else {
    }
    %c0 = arith.constant 0 : index
    %c0_1 = arith.constant 0 : index
    %3 = vector.load %arg2[%c0, %c0_1] : memref<64x32xf32, #tpu.memory_space<vmem>>, vector<64x32xf32>
    %c0_2 = arith.constant 0 : index
    %c0_3 = arith.constant 0 : index
    %4 = vector.load %arg3[%c0_2, %c0_3] : memref<32x256xf32, #tpu.memory_space<vmem>>, vector<32x256xf32>
    %cst = arith.constant dense<0.000000e+00> : vector<64x256xf32>
    %5 = tpu.matmul %3, %4, %cst {dimension_numbers = #tpu.dot_dimension_numbers<[1], [0], [0], [1], [0, 0, 1, 1], [], []>} : vector<64x32xf32>, vector<32x256xf32>, vector<64x256xf32> -> vector<64x256xf32>
    %c0_4 = arith.constant 0 : index
    %c0_5 = arith.constant 0 : index
    %6 = vector.load %arg4[%c0_4, %c0_5] : memref<1x256xf32, #tpu.memory_space<vmem>>, vector<1x256xf32>
    %7 = vector.broadcast %6 : vector<1x256xf32> to vector<64x256xf32>
    %8 = arith.addf %5, %7 : vector<64x256xf32>
    %9 = vector.extract_strided_slice %8 {offsets = [0, 0], sizes = [64, 128], strides = [1, 1]} : vector<64x256xf32> to vector<64x128xf32>
    %10 = vector.extract_strided_slice %8 {offsets = [0, 128], sizes = [64, 128], strides = [1, 1]} : vector<64x256xf32> to vector<64x128xf32>
    %cst_6 = arith.constant 5.000000e-01 : f32
    %11 = vector.broadcast %cst_6 : f32 to vector<64x128xf32>
    %12 = arith.mulf %11, %9 : vector<64x128xf32>
    %cst_7 = arith.constant 0.707106769 : f32
    %13 = vector.broadcast %cst_7 : f32 to vector<64x128xf32>
    %14 = arith.mulf %9, %13 : vector<64x128xf32>
    %15 = math.erf %14 : vector<64x128xf32>
    %cst_8 = arith.constant 1.000000e+00 : f32
    %16 = vector.broadcast %cst_8 : f32 to vector<64x128xf32>
    %17 = arith.addf %16, %15 : vector<64x128xf32>
    %18 = arith.mulf %12, %17 : vector<64x128xf32>
    %19 = arith.mulf %18, %10 : vector<64x128xf32>
    %c0_9 = arith.constant 0 : index
    %c0_10 = arith.constant 0 : index
    %20 = vector.load %arg8[%c0_9, %c0_10] : memref<64x32xf32, #tpu.memory_space<vmem>>, vector<64x32xf32>
    %c0_11 = arith.constant 0 : index
    %c0_12 = arith.constant 0 : index
    %21 = vector.load %arg5[%c0_11, %c0_12] : memref<128x32xf32, #tpu.memory_space<vmem>>, vector<128x32xf32>
    %cst_13 = arith.constant dense<0.000000e+00> : vector<64x32xf32>
    %22 = tpu.matmul %19, %21, %cst_13 {dimension_numbers = #tpu.dot_dimension_numbers<[1], [0], [0], [1], [0, 0, 1, 1], [], []>} : vector<64x128xf32>, vector<128x32xf32>, vector<64x32xf32> -> vector<64x32xf32>
    %23 = arith.addf %20, %22 : vector<64x32xf32>
    %c0_14 = arith.constant 0 : index
    %c0_15 = arith.constant 0 : index
    %24 = vector.load %arg8[%c0_14, %c0_15] : memref<64x32xf32, #tpu.memory_space<vmem>>, vector<64x32xf32>
    tpu.vector_store %arg8[%c0_14, %c0_15], %23 {strides = array<i32>} : memref<64x32xf32, #tpu.memory_space<vmem>>, vector<64x32xf32>,
    %c0_i32_16 = arith.constant 0 : i32
    %25 = arith.cmpi eq, %arg1, %c0_i32_16 : i32
    %26 = arith.extui %25 : i1 to i32
    %c0_i32_17 = arith.constant 0 : i32
    %27 = arith.cmpi ne, %26, %c0_i32_17 : i32
    scf.if %27 {
      %c0_18 = arith.constant 0 : index
      %c0_19 = arith.constant 0 : index
      %28 = vector.load %arg8[%c0_18, %c0_19] : memref<64x32xf32, #tpu.memory_space<vmem>>, vector<64x32xf32>
      %c0_20 = arith.constant 0 : index
      %c0_21 = arith.constant 0 : index
      %29 = vector.load %arg6[%c0_20, %c0_21] : memref<1x32xf32, #tpu.memory_space<vmem>>, vector<1x32xf32>
      %30 = vector.broadcast %29 : vector<1x32xf32> to vector<64x32xf32>
      %31 = arith.addf %28, %30 : vector<64x32xf32>
      %c0_22 = arith.constant 0 : index
      %c0_23 = arith.constant 0 : index
      %32 = vector.load %arg7[%c0_22, %c0_23] : memref<64x32xf32, #tpu.memory_space<vmem>>, vector<64x32xf32>
      tpu.vector_store %arg7[%c0_22, %c0_23], %31 {strides = array<i32>} : memref<64x32xf32, #tpu.memory_space<vmem>>, vector<64x32xf32>,
    } else {
    }
    return
  }
  func.func @transform_0(%arg0: i32, %arg1: i32) -> (i32, i32) {
    %c0_i32 = arith.constant 0 : i32
    %c0_i32_0 = arith.constant 0 : i32
    return %arg0, %c0_i32 : i32, i32
  }
  func.func @transform_1(%arg0: i32, %arg1: i32) -> (i32, i32) {
    %c0_i32 = arith.constant 0 : i32
    %c0_i32_0 = arith.constant 0 : i32
    return %c0_i32, %arg1 : i32, i32
  }
  func.func @transform_2(%arg0: i32, %arg1: i32) -> (i32, i32) {
    %c0_i32 = arith.constant 0 : i32
    %c0_i32_0 = arith.constant 0 : i32
    return %c0_i32, %arg1 : i32, i32
  }
  func.func @transform_3(%arg0: i32, %arg1: i32) -> (i32, i32) {
    %c0_i32 = arith.constant 0 : i32
    %c0_i32_0 = arith.constant 0 : i32
    return %arg1, %c0_i32 : i32, i32
  }
  func.func @transform_4(%arg0: i32, %arg1: i32) -> (i32, i32) {
    %c0_i32 = arith.constant 0 : i32
    %c0_i32_0 = arith.constant 0 : i32
    %c0_i32_1 = arith.constant 0 : i32
    return %c0_i32, %c0_i32_0 : i32, i32
  }
  func.func @transform_5(%arg0: i32, %arg1: i32) -> (i32, i32) {
    %c0_i32 = arith.constant 0 : i32
    %c0_i32_0 = arith.constant 0 : i32
    return %arg0, %c0_i32 : i32, i32
  }
}

</mosaic_0001>

<bundles_post_ra>
// kernel: tpu_custom_call.1
= control target key start
LH: loop header
LB: loop body
LE: loop exit
PB: predicated region body
PF: predicated region fallthrough
CT: control target
= control target key end

     0   :  { %vm24_vm0 = vcmask 261120   ;;  %v556_v3 = vmov 0.0   ;;  %v51_v33 = vlaneseq  ;;  %s755_s1 = inlined_call_operand.vmem [shape: f32[32,256], index: 1, kind: input, shape index: {}]   ;;  %s756_s3 = inlined_call_operand.vmem [shape: f32[128,32], index: 3, kind: input, shape index: {}]   ;;  %s757_s0 = inlined_call_operand.vmem [shape: f32[64,32], index: 0, kind: input, shape index: {}]   ;;  %s758_s2 = inlined_call_operand.vmem [shape: f32[1,256], index: 2, kind: input, shape index: {}]   ;;  %s759_s4 = inlined_call_operand.vmem [shape: f32[1,32], index: 4, kind: input, shape index: {}]   ;;  %s760_s5 = inlined_call_operand.vmem [shape: f32[64,32], index: 5, kind: output, shape index: {}]  }
   0x1   :  { %v48_v0 = vld [vmem:[%s755_s1 + $0x38] sm:$0xff]  ;;  %v47_v1 = vld [vmem:[%s755_s1 + $0x30] sm:$0xff]  ;;  %v46_v2 = vld [vmem:[%s755_s1 + $0x28] sm:$0xff]  ;;  %150 = vmatprep.mubr.f32.mxu0 %v556_v3  ;;  %25 = vst.msk [vmem:[#allocation2] sm:$0xff] %vm24_vm0, %v556_v3 }
   0x2   :  { %26 = vst.msk [vmem:[#allocation2 + $0x8] sm:$0xff] %vm24_vm0, %v556_v3  ;;  %27 = vst.msk [vmem:[#allocation2 + $0x10] sm:$0xff] %vm24_vm0, %v556_v3  ;;  %110 = vmatprep.subr.mxu0 %v48_v0  ;;  %v45_v4 = vld [vmem:[%s755_s1 + $0x20] sm:$0xff]  ;;  %v44_v5 = vld [vmem:[%s755_s1 + $0x18] sm:$0xff]  ;;  %v52_v34 = vshrl.u32 %v51_v33, 7 }
   0x3   :  { %28 = vst.msk [vmem:[#allocation2 + $0x18] sm:$0xff] %vm24_vm0, %v556_v3  ;;  %29 = vst.msk [vmem:[#allocation2 + $0x20] sm:$0xff] %vm24_vm0, %v556_v3  ;;  %111 = vmatpush1.msra.mxu0 %v47_v1  ;;  %v43_v6 = vld [vmem:[%s755_s1 + $0x10] sm:$0xff]  ;;  %v42_v7 = vld [vmem:[%s755_s1 + $0x8] sm:$0xff] }
   0x4   :  { %30 = vst.msk [vmem:[#allocation2 + $0x28] sm:$0xff] %vm24_vm0, %v556_v3  ;;  %31 = vst.msk [vmem:[#allocation2 + $0x30] sm:$0xff] %vm24_vm0, %v556_v3  ;;  %112 = vmatprep.subr.mxu0 %v46_v2  ;;  %v41_v8 = vld [vmem:[%s755_s1] sm:$0xff]  ;;  %v270_v9 = vld [vmem:[%s756_s3 + $0x78] sm:$0xff]  ;;  %v53_v35 = vsub.s32 0, %v52_v34  ;;  %v57_v51 = vsub.s32 1, %v52_v34 }
   0x5   :  { %32 = vst.msk [vmem:[#allocation2 + $0x38] sm:$0xff] %vm24_vm0, %v556_v3  ;;  %113 = vmatpush1.msra.mxu0 %v45_v4  ;;  %v33_v10 = vld [vmem:[%s757_s0] sm:$0xff]  ;;  %507 = vmatprep.subr.mxu1 %v270_v9  ;;  %v269_v11 = vld [vmem:[%s756_s3 + $0x70] sm:$0xff]  ;;  %v34_v12 = vld [vmem:[%s757_s0 + $0x8] sm:$0xff] }
   0x6   :  { %114 = vmatprep.subr.mxu0 %v44_v5  ;;  %523 = vmatpush3.msra.mxu1 %v270_v9  ;;  %v35_v13 = vld [vmem:[%s757_s0 + $0x10] sm:$0xff]  ;;  %v36_v14 = vld [vmem:[%s757_s0 + $0x18] sm:$0xff]  ;;  %v37_v15 = vld [vmem:[%s757_s0 + $0x20] sm:$0xff] }
   0x7   :  { %115 = vmatpush1.msra.mxu0 %v43_v6  ;;  %508 = vmatprep.subr.mxu1 %v269_v11  ;;  %v38_v16 = vld [vmem:[%s757_s0 + $0x28] sm:$0xff]  ;;  %v39_v17 = vld [vmem:[%s757_s0 + $0x30] sm:$0xff]  ;;  %v40_v18 = vld [vmem:[%s757_s0 + $0x38] sm:$0xff] }
   0x8   :  { %116 = vmatprep.subr.mxu0 %v42_v7  ;;  %524 = vmatpush3.msra.mxu1 %v269_v11  ;;  %v268_v19 = vld [vmem:[%s756_s3 + $0x68] sm:$0xff]  ;;  %v267_v20 = vld [vmem:[%s756_s3 + $0x60] sm:$0xff]  ;;  %v266_v21 = vld [vmem:[%s756_s3 + $0x58] sm:$0xff] }
   0x9   :  { %117 = vmatpush1.msra.mxu0 %v41_v8  ;;  %509 = vmatprep.subr.mxu1 %v268_v19  ;;  %v265_v22 = vld [vmem:[%s756_s3 + $0x50] sm:$0xff]  ;;  %v264_v23 = vld [vmem:[%s756_s3 + $0x48] sm:$0xff]  ;;  %v263_v24 = vld [vmem:[%s756_s3 + $0x40] sm:$0xff] }
   0xa   :  { %430 = vmatmul.mubr.msk.f32.vlgmr.msra.gmra.mxu0 %vm24_vm0, %v33_v10  ;;  %463 = vmatprep.subr.mxu0 %v270_v9  ;;  %v262_v25 = vld [vmem:[%s756_s3 + $0x38] sm:$0xff]  ;;  %v261_v26 = vld [vmem:[%s756_s3 + $0x30] sm:$0xff]  ;;  %v260_v27 = vld [vmem:[%s756_s3 + $0x28] sm:$0xff] }
   0xb   :  { %156 = vmatprep.mubr.f32.mxu0 %v556_v3  ;;  %464 = vmatpush3.msra.mxu0 %v270_v9  ;;  %v259_v28 = vld [vmem:[%s756_s3 + $0x20] sm:$0xff]  ;;  %v258_v29 = vld [vmem:[%s756_s3 + $0x18] sm:$0xff]  ;;  %v257_v30 = vld [vmem:[%s756_s3 + $0x10] sm:$0xff] }
   0xc   :  { %465 = vmatprep.subr.mxu0 %v269_v11  ;;  %525 = vmatpush3.msra.mxu1 %v268_v19  ;;  %v256_v31 = vld [vmem:[%s756_s3 + $0x8] sm:$0xff]  ;;  %v255_v32 = vld [vmem:[%s756_s3] sm:$0xff] }
   0xd   :  { %466 = vmatpush3.msra.mxu0 %v269_v11  ;;  %510 = vmatprep.subr.mxu1 %v267_v20  ;;  %v49_v36 = vld [vmem:[%s758_s2] sm:$0x3] }
   0xe   :  { %431 = vmatmul.mubr.msk.f32.gmra.mxu0 %vm24_vm0, %v34_v12  ;;  %467 = vmatprep.subr.mxu0 %v268_v19  ;;  %v54_v37 = vrot.slane %v49_v36, %v53_v35  ;;  %v702_v56 = vrot.slane %v49_v36, %v57_v51 }
   0xf   :  { %162 = vmatprep.mubr.f32.mxu0 %v556_v3  ;;  %468 = vmatpush3.msra.mxu0 %v268_v19 }
  0x10   :  { %469 = vmatprep.subr.mxu0 %v267_v20  ;;  %526 = vmatpush3.msra.mxu1 %v267_v20 }
  0x11   :  { %470 = vmatpush3.msra.mxu0 %v267_v20  ;;  %511 = vmatprep.subr.mxu1 %v266_v21 }
  0x12   :  { %432 = vmatmul.mubr.msk.f32.gmra.mxu0 %vm24_vm0, %v35_v13  ;;  %471 = vmatprep.subr.mxu0 %v266_v21 }
  0x13   :  { %168 = vmatprep.mubr.f32.mxu0 %v556_v3  ;;  %472 = vmatpush3.msra.mxu0 %v266_v21 }
  0x14   :  { %527 = vmatpush3.msra.mxu1 %v266_v21  ;;  %473 = vmatprep.subr.mxu0 %v265_v22 }
  0x15   :  { %512 = vmatprep.subr.mxu1 %v265_v22  ;;  %474 = vmatpush3.msra.mxu0 %v265_v22 }
  0x16   :  { %433 = vmatmul.mubr.msk.f32.gmra.mxu0 %vm24_vm0, %v36_v14  ;;  %528 = vmatpush3.msra.mxu1 %v265_v22 }
  0x17   :  { %174 = vmatprep.mubr.f32.mxu0 %v556_v3  ;;  %475 = vmatprep.subr.mxu0 %v264_v23 }
  0x18   :  { %513 = vmatprep.subr.mxu1 %v264_v23  ;;  %476 = vmatpush3.msra.mxu0 %v264_v23 }
  0x19   :  { %529 = vmatpush3.msra.mxu1 %v264_v23  ;;  %477 = vmatprep.subr.mxu0 %v263_v24 }
  0x1a   :  { %434 = vmatmul.mubr.msk.f32.gmra.mxu0 %vm24_vm0, %v37_v15  ;;  %514 = vmatprep.subr.mxu1 %v263_v24 }
  0x1b   :  { %180 = vmatprep.mubr.f32.mxu0 %v556_v3  ;;  %478 = vmatpush3.msra.mxu0 %v263_v24 }
  0x1c   :  { %530 = vmatpush3.msra.mxu1 %v263_v24  ;;  %479 = vmatprep.subr.mxu0 %v262_v25 }
  0x1d   :  { %515 = vmatprep.subr.mxu1 %v262_v25  ;;  %480 = vmatpush3.msra.mxu0 %v262_v25 }
  0x1e   :  { %435 = vmatmul.mubr.msk.f32.gmra.mxu0 %vm24_vm0, %v38_v16  ;;  %531 = vmatpush3.msra.mxu1 %v262_v25 }
  0x1f   :  { %186 = vmatprep.mubr.f32.mxu0 %v556_v3  ;;  %481 = vmatprep.subr.mxu0 %v261_v26 }
  0x20   :  { %516 = vmatprep.subr.mxu1 %v261_v26  ;;  %482 = vmatpush3.msra.mxu0 %v261_v26 }
  0x21   :  { %532 = vmatpush3.msra.mxu1 %v261_v26  ;;  %483 = vmatprep.subr.mxu0 %v260_v27 }
  0x22   :  { %436 = vmatmul.mubr.msk.f32.gmra.mxu0 %vm24_vm0, %v39_v17  ;;  %517 = vmatprep.subr.mxu1 %v260_v27 }
  0x23   :  { %192 = vmatprep.mubr.f32.mxu0 %v556_v3  ;;  %484 = vmatpush3.msra.mxu0 %v260_v27 }
  0x24   :  { %533 = vmatpush3.msra.mxu1 %v260_v27  ;;  %485 = vmatprep.subr.mxu0 %v259_v28 }
  0x25   :  { %518 = vmatprep.subr.mxu1 %v259_v28  ;;  %486 = vmatpush3.msra.mxu0 %v259_v28 }
  0x26   :  { %437 = vmatmul.mubr.msk.f32.gmra.mxu0 %vm24_vm0, %v40_v18  ;;  %534 = vmatpush3.msra.mxu1 %v259_v28 }
  0x27   :  { %487 = vmatprep.subr.mxu0 %v258_v29  ;;  %519 = vmatprep.subr.mxu1 %v258_v29 }
  0x28   :  { %488 = vmatpush3.msra.mxu0 %v258_v29  ;;  %535 = vmatpush3.msra.mxu1 %v258_v29 }
  0x29   :  { %489 = vmatprep.subr.mxu0 %v257_v30  ;;  %520 = vmatprep.subr.mxu1 %v257_v30 }
  0x2a   :  { %490 = vmatpush3.msra.mxu0 %v257_v30  ;;  %536 = vmatpush3.msra.mxu1 %v257_v30 }
  0x2b   :  { %491 = vmatprep.subr.mxu0 %v256_v31  ;;  %521 = vmatprep.subr.mxu1 %v256_v31 }
  0x2c   :  { %492 = vmatpush3.msra.mxu0 %v256_v31  ;;  %537 = vmatpush3.msra.mxu1 %v256_v31 }
  0x2d   :  { %493 = vmatprep.subr.mxu0 %v255_v32  ;;  %522 = vmatprep.subr.mxu1 %v255_v32 }
  0x2e   :  { %494 = vmatpush3.msra.mxu0 %v255_v32  ;;  %538 = vmatpush3.msra.mxu1 %v255_v32 }
  0xca   :  { %v152_v38 = vpop.f32.mrf.mxu0 }
  0xcb   :  { %v153_v39 = vadd.f32 %v152_v38, %v54_v37 }
  0xcc   :  { %v154_v40 = vpop.f32.mrf.mxu0 }
  0xcd   :  { %v207_v41 = vmul.f32 0.70710677, %v153_v39  ;;  %v199_v60 = vmul.f32 0.5, %v153_v39  ;;  %v155_v0 = vadd.f32 %v154_v40, %v702_v56 }
  0xce   :  { %v158_v42 = vpop.f32.mrf.mxu0 }
  0xcf   :  { %540 = verf.f32 %v207_v41  ;;  %v159_v43 = vadd.f32 %v158_v42, %v54_v37 }
  0xd0   :  { %v160_v44 = vpop.f32.mrf.mxu0 }
  0xd1   :  { %v208_v45 = vmul.f32 0.70710677, %v159_v43  ;;  %v200_v6 = vmul.f32 0.5, %v159_v43  ;;  %v161_v10 = vadd.f32 %v160_v44, %v702_v56 }
  0xd2   :  { %v164_v46 = vpop.f32.mrf.mxu0 }
  0xd3   :  { %542 = verf.f32 %v208_v45  ;;  %v165_v47 = vadd.f32 %v164_v46, %v54_v37 }
  0xd4   :  { %v166_v48 = vpop.f32.mrf.mxu0 }
  0xd5   :  { %v209_v49 = vmul.f32 0.70710677, %v165_v47  ;;  %v201_v17 = vmul.f32 0.5, %v165_v47  ;;  %v167_v22 = vadd.f32 %v166_v48, %v702_v56 }
  0xd6   :  { %v170_v50 = vpop.f32.mrf.mxu0 }
  0xd7   :  { %544 = verf.f32 %v209_v49  ;;  %v171_v52 = vadd.f32 %v170_v50, %v54_v37 }
  0xd8   :  { %v172_v53 = vpop.f32.mrf.mxu0 }
  0xd9   :  { %v210_v54 = vmul.f32 0.70710677, %v171_v52  ;;  %v202_v24 = vmul.f32 0.5, %v171_v52  ;;  %v173_v28 = vadd.f32 %v172_v53, %v702_v56 }
  0xda   :  { %v176_v55 = vpop.f32.mrf.mxu0 }
  0xdb   :  { %546 = verf.f32 %v210_v54  ;;  %v177_v57 = vadd.f32 %v176_v55, %v54_v37 }
  0xdc   :  { %v541_v58 = vpop.eup %540  ;;  %v178_v59 = vpop.f32.mrf.mxu0 }
  0xdd   :  { %v223_v61 = vadd.f32 1.0, %v541_v58  ;;  %v211_v62 = vmul.f32 0.70710677, %v177_v57  ;;  %v203_v32 = vmul.f32 0.5, %v177_v57  ;;  %v179_v34 = vadd.f32 %v178_v59, %v702_v56  ;;  %v248_v57 = vld [vmem:[#allocation2 + $0x8] sm:$0xff]  ;;  %v247_v59 = vld [vmem:[#allocation2] sm:$0xff] }
  0xde   :  { %v182_v63 = vpop.f32.mrf.mxu0 }
  0xdf   :  { %v231_v1 = vmul.f32 %v223_v61, %v199_v60  ;;  %548 = verf.f32 %v211_v62  ;;  %v183_v2 = vadd.f32 %v182_v63, %v54_v37  ;;  %v250_v63 = vld [vmem:[#allocation2 + $0x18] sm:$0xff] }
  0xe0   :  { %v543_v3 = vpop.eup %542  ;;  %v184_v4 = vpop.f32.mrf.mxu0 }
  0xe1   :  { %v239_v5 = vmul.f32 %v231_v1, %v155_v0  ;;  %v224_v7 = vadd.f32 1.0, %v543_v3  ;;  %v212_v8 = vmul.f32 0.70710677, %v183_v2  ;;  %v204_v38 = vmul.f32 0.5, %v183_v2  ;;  %v438_v0 = vld [vmem:[%s759_s4] ss:$0 sm:$0xff] }
  0xe2   :  { %v188_v9 = vpop.f32.mrf.mxu0  ;;  %v185_v40 = vadd.f32 %v184_v4, %v702_v56  ;;  %v249_v1 = vld [vmem:[#allocation2 + $0x10] sm:$0xff] }
  0xe3   :  { %v232_v11 = vmul.f32 %v224_v7, %v200_v6  ;;  %550 = verf.f32 %v212_v8  ;;  %v189_v12 = vadd.f32 %v188_v9, %v54_v37  ;;  %495 = vmatprep.mubr.f32.mxu0 %v239_v5  ;;  %v252_v9 = vld [vmem:[#allocation2 + $0x28] sm:$0xff] }
  0xe4   :  { %v545_v13 = vpop.eup %544  ;;  %v190_v14 = vpop.f32.mrf.mxu0 }
  0xe5   :  { %v240_v15 = vmul.f32 %v232_v11, %v161_v10  ;;  %v213_v16 = vmul.f32 0.70710677, %v189_v12  ;;  %v225_v19 = vadd.f32 1.0, %v545_v13  ;;  %v205_v44 = vmul.f32 0.5, %v189_v12  ;;  %v251_v11 = vld [vmem:[#allocation2 + $0x20] sm:$0xff] }
  0xe6   :  { %v194_v18 = vpop.f32.mrf.mxu0  ;;  %v191_v46 = vadd.f32 %v190_v14, %v702_v56 }
  0xe7   :  { %552 = verf.f32 %v213_v16  ;;  %v195_v20 = vadd.f32 %v194_v18, %v54_v37  ;;  %496 = vmatmul.mubr.f32.vlgmr.msra.gmra.mxu0 %v240_v15  ;;  %v233_v23 = vmul.f32 %v225_v19, %v201_v17  ;;  %v254_v19 = vld [vmem:[#allocation2 + $0x38] sm:$0xff] }
  0xe8   :  { %v547_v21 = vpop.eup %546  ;;  %v196_v49 = vpop.f32.mrf.mxu0 }
  0xe9   :  { %v226_v25 = vadd.f32 1.0, %v547_v21  ;;  %v214_v26 = vmul.f32 0.70710677, %v195_v20  ;;  %v241_v27 = vmul.f32 %v233_v23, %v167_v22  ;;  %v206_v51 = vmul.f32 0.5, %v195_v20  ;;  %v253_v21 = vld [vmem:[#allocation2 + $0x30] sm:$0xff] }
  0xea   :  { %v197_v53 = vadd.f32 %v196_v49, %v702_v56 }
  0xeb   :  { %v234_v29 = vmul.f32 %v226_v25, %v202_v24  ;;  %554 = verf.f32 %v214_v26  ;;  %498 = vmatprep.mubr.f32.mxu1 %v241_v27 }
  0xec   :  { %v549_v30 = vpop.eup %548 }
  0xed   :  { %v242_v31 = vmul.f32 %v234_v29, %v173_v28  ;;  %v227_v33 = vadd.f32 1.0, %v549_v30 }
  0xef   :  { %v235_v35 = vmul.f32 %v227_v33, %v203_v32  ;;  %499 = vmatmul.mubr.f32.vlgmr.msra.gmra.mxu1 %v242_v31 }
  0xf0   :  { %v551_v36 = vpop.eup %550 }
  0xf1   :  { %v243_v37 = vmul.f32 %v235_v35, %v179_v34  ;;  %v228_v39 = vadd.f32 1.0, %v551_v36 }
  0xf3   :  { %v236_v41 = vmul.f32 %v228_v39, %v204_v38  ;;  %501 = vmatprep.mubr.f32.mxu1 %v243_v37 }
  0xf4   :  { %v553_v42 = vpop.eup %552 }
  0xf5   :  { %v244_v43 = vmul.f32 %v236_v41, %v185_v40  ;;  %v229_v45 = vadd.f32 1.0, %v553_v42 }
  0xf7   :  { %v237_v47 = vmul.f32 %v229_v45, %v205_v44  ;;  %502 = vmatmul.mubr.f32.gmra.mxu1 %v244_v43 }
  0xf8   :  { %v555_v48 = vpop.eup %554 }
  0xf9   :  { %v245_v50 = vmul.f32 %v237_v47, %v191_v46  ;;  %v230_v52 = vadd.f32 1.0, %v555_v48 }
  0xfb   :  { %v238_v54 = vmul.f32 %v230_v52, %v206_v51  ;;  %504 = vmatprep.mubr.f32.mxu1 %v245_v50 }
  0xfd   :  { %v246_v55 = vmul.f32 %v238_v54, %v197_v53 }
  0xff   :  { %505 = vmatmul.mubr.f32.gmra.mxu1 %v246_v55 }
 0x1a7   :  { %v497_v58 = vpop.f32.mrf.mxu0 }
 0x1a8   :  { %v377_v60 = vadd.f32 %v497_v58, %v248_v57 }
 0x1a9   :  { %v337_v61 = vpop.f32.mrf.mxu0 }
 0x1aa   :  { %385 = vst.msk [vmem:[#allocation2 + $0x8] sm:$0xff] %vm24_vm0, %v377_v60  ;;  %v376_v62 = vadd.f32 %v337_v61, %v247_v59 }
 0x1ac   :  { %384 = vst.msk [vmem:[#allocation2] sm:$0xff] %vm24_vm0, %v376_v62 }
 0x1af   :  { %v500_v56 = vpop.f32.mrf.mxu1 }
 0x1b0   :  { %v379_v2 = vadd.f32 %v500_v56, %v250_v63 }
 0x1b1   :  { %v396_v3 = vld [vmem:[#allocation2 + $0x8] sm:$0xff]  ;;  %v347_v4 = vpop.f32.mrf.mxu1 }
 0x1b2   :  { %v411_v5 = vadd.f32 %v438_v0, %v396_v3  ;;  %387 = vst.msk [vmem:[#allocation2 + $0x18] sm:$0xff] %vm24_vm0, %v379_v2  ;;  %v378_v6 = vadd.f32 %v347_v4, %v249_v1 }
 0x1b3   :  { %v395_v7 = vld [vmem:[#allocation2] sm:$0xff] }
 0x1b4   :  { %419 = vst.msk [vmem:[%s760_s5 + $0x8] sm:$0xff] %vm24_vm0, %v411_v5  ;;  %v410_v8 = vadd.f32 %v438_v0, %v395_v7  ;;  %386 = vst.msk [vmem:[#allocation2 + $0x10] sm:$0xff] %vm24_vm0, %v378_v6 }
 0x1b6   :  { %418 = vst.msk [vmem:[%s760_s5] sm:$0xff] %vm24_vm0, %v410_v8 }
 0x1b7   :  { %v503_v10 = vpop.f32.mrf.mxu1 }
 0x1b8   :  { %v381_v12 = vadd.f32 %v503_v10, %v252_v9 }
 0x1b9   :  { %v398_v13 = vld [vmem:[#allocation2 + $0x18] sm:$0xff]  ;;  %v357_v14 = vpop.f32.mrf.mxu1 }
 0x1ba   :  { %v413_v15 = vadd.f32 %v438_v0, %v398_v13  ;;  %389 = vst.msk [vmem:[#allocation2 + $0x28] sm:$0xff] %vm24_vm0, %v381_v12  ;;  %v380_v16 = vadd.f32 %v357_v14, %v251_v11 }
 0x1bb   :  { %v397_v17 = vld [vmem:[#allocation2 + $0x10] sm:$0xff] }
 0x1bc   :  { %421 = vst.msk [vmem:[%s760_s5 + $0x18] sm:$0xff] %vm24_vm0, %v413_v15  ;;  %v412_v18 = vadd.f32 %v438_v0, %v397_v17  ;;  %388 = vst.msk [vmem:[#allocation2 + $0x20] sm:$0xff] %vm24_vm0, %v380_v16 }
 0x1be   :  { %420 = vst.msk [vmem:[%s760_s5 + $0x10] sm:$0xff] %vm24_vm0, %v412_v18 }
 0x1bf   :  { %v506_v20 = vpop.f32.mrf.mxu1 }
 0x1c0   :  { %v383_v22 = vadd.f32 %v506_v20, %v254_v19 }
 0x1c1   :  { %v400_v23 = vld [vmem:[#allocation2 + $0x28] sm:$0xff]  ;;  %v367_v24 = vpop.f32.mrf.mxu1 }
 0x1c2   :  { %v415_v25 = vadd.f32 %v438_v0, %v400_v23  ;;  %391 = vst.msk [vmem:[#allocation2 + $0x38] sm:$0xff] %vm24_vm0, %v383_v22  ;;  %v382_v26 = vadd.f32 %v367_v24, %v253_v21 }
 0x1c3   :  { %v399_v27 = vld [vmem:[#allocation2 + $0x20] sm:$0xff] }
 0x1c4   :  { %423 = vst.msk [vmem:[%s760_s5 + $0x28] sm:$0xff] %vm24_vm0, %v415_v25  ;;  %v414_v28 = vadd.f32 %v438_v0, %v399_v27  ;;  %390 = vst.msk [vmem:[#allocation2 + $0x30] sm:$0xff] %vm24_vm0, %v382_v26 }
 0x1c6   :  { %422 = vst.msk [vmem:[%s760_s5 + $0x20] sm:$0xff] %vm24_vm0, %v414_v28 }
 0x1c9   :  { %v402_v29 = vld [vmem:[#allocation2 + $0x38] sm:$0xff] }
 0x1ca   :  { %v417_v30 = vadd.f32 %v438_v0, %v402_v29 }
 0x1cb   :  { %v401_v31 = vld [vmem:[#allocation2 + $0x30] sm:$0xff] }
 0x1cc   :  { %425 = vst.msk [vmem:[%s760_s5 + $0x38] sm:$0xff] %vm24_vm0, %v417_v30  ;;  %v416_v32 = vadd.f32 %v438_v0, %v401_v31 }
 0x1ce   :  { %424 = vst.msk [vmem:[%s760_s5 + $0x30] sm:$0xff] %vm24_vm0, %v416_v32 }

// kernel: tpu_custom_call.1
= control target key start
LH: loop header
LB: loop body
LE: loop exit
PB: predicated region body
PF: predicated region fallthrough
CT: control target
= control target key end

     0   :  { %vm24_vm0 = vcmask 261120   ;;  %v556_v3 = vmov 0.0   ;;  %v51_v33 = vlaneseq  ;;  %s755_s1 = inlined_call_operand.vmem [shape: f32[32,256], index: 1, kind: input, shape index: {}]   ;;  %s756_s3 = inlined_call_operand.vmem [shape: f32[128,32], index: 3, kind: input, shape index: {}]   ;;  %s757_s0 = inlined_call_operand.vmem [shape: f32[64,32], index: 0, kind: input, shape index: {}]   ;;  %s758_s2 = inlined_call_operand.vmem [shape: f32[1,256], index: 2, kind: input, shape index: {}]   ;;  %s759_s4 = inlined_call_operand.vmem [shape: f32[1,32], index: 4, kind: input, shape index: {}]   ;;  %s760_s5 = inlined_call_operand.vmem [shape: f32[64,32], index: 5, kind: output, shape index: {}]  }
   0x1   :  { %v48_v0 = vld [vmem:[%s755_s1 + $0x38] sm:$0xff]  ;;  %v47_v1 = vld [vmem:[%s755_s1 + $0x30] sm:$0xff]  ;;  %v46_v2 = vld [vmem:[%s755_s1 + $0x28] sm:$0xff]  ;;  %150 = vmatprep.mubr.f32.mxu0 %v556_v3  ;;  %25 = vst.msk [vmem:[#allocation2] sm:$0xff] %vm24_vm0, %v556_v3 }
   0x2   :  { %26 = vst.msk [vmem:[#allocation2 + $0x8] sm:$0xff] %vm24_vm0, %v556_v3  ;;  %27 = vst.msk [vmem:[#allocation2 + $0x10] sm:$0xff] %vm24_vm0, %v556_v3  ;;  %110 = vmatprep.subr.mxu0 %v48_v0  ;;  %v45_v4 = vld [vmem:[%s755_s1 + $0x20] sm:$0xff]  ;;  %v44_v5 = vld [vmem:[%s755_s1 + $0x18] sm:$0xff]  ;;  %v52_v34 = vshrl.u32 %v51_v33, 7 }
   0x3   :  { %28 = vst.msk [vmem:[#allocation2 + $0x18] sm:$0xff] %vm24_vm0, %v556_v3  ;;  %29 = vst.msk [vmem:[#allocation2 + $0x20] sm:$0xff] %vm24_vm0, %v556_v3  ;;  %111 = vmatpush1.msra.mxu0 %v47_v1  ;;  %v43_v6 = vld [vmem:[%s755_s1 + $0x10] sm:$0xff]  ;;  %v42_v7 = vld [vmem:[%s755_s1 + $0x8] sm:$0xff] }
   0x4   :  { %30 = vst.msk [vmem:[#allocation2 + $0x28] sm:$0xff] %vm24_vm0, %v556_v3  ;;  %31 = vst.msk [vmem:[#allocation2 + $0x30] sm:$0xff] %vm24_vm0, %v556_v3  ;;  %112 = vmatprep.subr.mxu0 %v46_v2  ;;  %v41_v8 = vld [vmem:[%s755_s1] sm:$0xff]  ;;  %v270_v9 = vld [vmem:[%s756_s3 + $0x78] sm:$0xff]  ;;  %v53_v35 = vsub.s32 0, %v52_v34  ;;  %v57_v51 = vsub.s32 1, %v52_v34 }
   0x5   :  { %32 = vst.msk [vmem:[#allocation2 + $0x38] sm:$0xff] %vm24_vm0, %v556_v3  ;;  %113 = vmatpush1.msra.mxu0 %v45_v4  ;;  %v33_v10 = vld [vmem:[%s757_s0] sm:$0xff]  ;;  %507 = vmatprep.subr.mxu1 %v270_v9  ;;  %v269_v11 = vld [vmem:[%s756_s3 + $0x70] sm:$0xff]  ;;  %v34_v12 = vld [vmem:[%s757_s0 + $0x8] sm:$0xff] }
   0x6   :  { %114 = vmatprep.subr.mxu0 %v44_v5  ;;  %523 = vmatpush3.msra.mxu1 %v270_v9  ;;  %v35_v13 = vld [vmem:[%s757_s0 + $0x10] sm:$0xff]  ;;  %v36_v14 = vld [vmem:[%s757_s0 + $0x18] sm:$0xff]  ;;  %v37_v15 = vld [vmem:[%s757_s0 + $0x20] sm:$0xff] }
   0x7   :  { %115 = vmatpush1.msra.mxu0 %v43_v6  ;;  %508 = vmatprep.subr.mxu1 %v269_v11  ;;  %v38_v16 = vld [vmem:[%s757_s0 + $0x28] sm:$0xff]  ;;  %v39_v17 = vld [vmem:[%s757_s0 + $0x30] sm:$0xff]  ;;  %v40_v18 = vld [vmem:[%s757_s0 + $0x38] sm:$0xff] }
   0x8   :  { %116 = vmatprep.subr.mxu0 %v42_v7  ;;  %524 = vmatpush3.msra.mxu1 %v269_v11  ;;  %v268_v19 = vld [vmem:[%s756_s3 + $0x68] sm:$0xff]  ;;  %v267_v20 = vld [vmem:[%s756_s3 + $0x60] sm:$0xff]  ;;  %v266_v21 = vld [vmem:[%s756_s3 + $0x58] sm:$0xff] }
   0x9   :  { %117 = vmatpush1.msra.mxu0 %v41_v8  ;;  %509 = vmatprep.subr.mxu1 %v268_v19  ;;  %v265_v22 = vld [vmem:[%s756_s3 + $0x50] sm:$0xff]  ;;  %v264_v23 = vld [vmem:[%s756_s3 + $0x48] sm:$0xff]  ;;  %v263_v24 = vld [vmem:[%s756_s3 + $0x40] sm:$0xff] }
   0xa   :  { %430 = vmatmul.mubr.msk.f32.vlgmr.msra.gmra.mxu0 %vm24_vm0, %v33_v10  ;;  %463 = vmatprep.subr.mxu0 %v270_v9  ;;  %v262_v25 = vld [vmem:[%s756_s3 + $0x38] sm:$0xff]  ;;  %v261_v26 = vld [vmem:[%s756_s3 + $0x30] sm:$0xff]  ;;  %v260_v27 = vld [vmem:[%s756_s3 + $0x28] sm:$0xff] }
   0xb   :  { %156 = vmatprep.mubr.f32.mxu0 %v556_v3  ;;  %464 = vmatpush3.msra.mxu0 %v270_v9  ;;  %v259_v28 = vld [vmem:[%s756_s3 + $0x20] sm:$0xff]  ;;  %v258_v29 = vld [vmem:[%s756_s3 + $0x18] sm:$0xff]  ;;  %v257_v30 = vld [vmem:[%s756_s3 + $0x10] sm:$0xff] }
   0xc   :  { %465 = vmatprep.subr.mxu0 %v269_v11  ;;  %525 = vmatpush3.msra.mxu1 %v268_v19  ;;  %v256_v31 = vld [vmem:[%s756_s3 + $0x8] sm:$0xff]  ;;  %v255_v32 = vld [vmem:[%s756_s3] sm:$0xff] }
   0xd   :  { %466 = vmatpush3.msra.mxu0 %v269_v11  ;;  %510 = vmatprep.subr.mxu1 %v267_v20  ;;  %v49_v36 = vld [vmem:[%s758_s2] sm:$0x3] }
   0xe   :  { %431 = vmatmul.mubr.msk.f32.gmra.mxu0 %vm24_vm0, %v34_v12  ;;  %467 = vmatprep.subr.mxu0 %v268_v19  ;;  %v54_v37 = vrot.slane %v49_v36, %v53_v35  ;;  %v702_v56 = vrot.slane %v49_v36, %v57_v51 }
   0xf   :  { %162 = vmatprep.mubr.f32.mxu0 %v556_v3  ;;  %468 = vmatpush3.msra.mxu0 %v268_v19 }
  0x10   :  { %469 = vmatprep.subr.mxu0 %v267_v20  ;;  %526 = vmatpush3.msra.mxu1 %v267_v20 }
  0x11   :  { %470 = vmatpush3.msra.mxu0 %v267_v20  ;;  %511 = vmatprep.subr.mxu1 %v266_v21 }
  0x12   :  { %432 = vmatmul.mubr.msk.f32.gmra.mxu0 %vm24_vm0, %v35_v13  ;;  %471 = vmatprep.subr.mxu0 %v266_v21 }
  0x13   :  { %168 = vmatprep.mubr.f32.mxu0 %v556_v3  ;;  %472 = vmatpush3.msra.mxu0 %v266_v21 }
  0x14   :  { %527 = vmatpush3.msra.mxu1 %v266_v21  ;;  %473 = vmatprep.subr.mxu0 %v265_v22 }
  0x15   :  { %512 = vmatprep.subr.mxu1 %v265_v22  ;;  %474 = vmatpush3.msra.mxu0 %v265_v22 }
  0x16   :  { %433 = vmatmul.mubr.msk.f32.gmra.mxu0 %vm24_vm0, %v36_v14  ;;  %528 = vmatpush3.msra.mxu1 %v265_v22 }
  0x17   :  { %174 = vmatprep.mubr.f32.mxu0 %v556_v3  ;;  %475 = vmatprep.subr.mxu0 %v264_v23 }
  0x18   :  { %513 = vmatprep.subr.mxu1 %v264_v23  ;;  %476 = vmatpush3.msra.mxu0 %v264_v23 }
  0x19   :  { %529 = vmatpush3.msra.mxu1 %v264_v23  ;;  %477 = vmatprep.subr.mxu0 %v263_v24 }
  0x1a   :  { %434 = vmatmul.mubr.msk.f32.gmra.mxu0 %vm24_vm0, %v37_v15  ;;  %514 = vmatprep.subr.mxu1 %v263_v24 }
  0x1b   :  { %180 = vmatprep.mubr.f32.mxu0 %v556_v3  ;;  %478 = vmatpush3.msra.mxu0 %v263_v24 }
  0x1c   :  { %530 = vmatpush3.msra.mxu1 %v263_v24  ;;  %479 = vmatprep.subr.mxu0 %v262_v25 }
  0x1d   :  { %515 = vmatprep.subr.mxu1 %v262_v25  ;;  %480 = vmatpush3.msra.mxu0 %v262_v25 }
  0x1e   :  { %435 = vmatmul.mubr.msk.f32.gmra.mxu0 %vm24_vm0, %v38_v16  ;;  %531 = vmatpush3.msra.mxu1 %v262_v25 }
  0x1f   :  { %186 = vmatprep.mubr.f32.mxu0 %v556_v3  ;;  %481 = vmatprep.subr.mxu0 %v261_v26 }
  0x20   :  { %516 = vmatprep.subr.mxu1 %v261_v26  ;;  %482 = vmatpush3.msra.mxu0 %v261_v26 }
  0x21   :  { %532 = vmatpush3.msra.mxu1 %v261_v26  ;;  %483 = vmatprep.subr.mxu0 %v260_v27 }
  0x22   :  { %436 = vmatmul.mubr.msk.f32.gmra.mxu0 %vm24_vm0, %v39_v17  ;;  %517 = vmatprep.subr.mxu1 %v260_v27 }
  0x23   :  { %192 = vmatprep.mubr.f32.mxu0 %v556_v3  ;;  %484 = vmatpush3.msra.mxu0 %v260_v27 }
  0x24   :  { %533 = vmatpush3.msra.mxu1 %v260_v27  ;;  %485 = vmatprep.subr.mxu0 %v259_v28 }
  0x25   :  { %518 = vmatprep.subr.mxu1 %v259_v28  ;;  %486 = vmatpush3.msra.mxu0 %v259_v28 }
  0x26   :  { %437 = vmatmul.mubr.msk.f32.gmra.mxu0 %vm24_vm0, %v40_v18  ;;  %534 = vmatpush3.msra.mxu1 %v259_v28 }
  0x27   :  { %487 = vmatprep.subr.mxu0 %v258_v29  ;;  %519 = vmatprep.subr.mxu1 %v258_v29 }
  0x28   :  { %488 = vmatpush3.msra.mxu0 %v258_v29  ;;  %535 = vmatpush3.msra.mxu1 %v258_v29 }
  0x29   :  { %489 = vmatprep.subr.mxu0 %v257_v30  ;;  %520 = vmatprep.subr.mxu1 %v257_v30 }
  0x2a   :  { %490 = vmatpush3.msra.mxu0 %v257_v30  ;;  %536 = vmatpush3.msra.mxu1 %v257_v30 }
  0x2b   :  { %491 = vmatprep.subr.mxu0 %v256_v31  ;;  %521 = vmatprep.subr.mxu1 %v256_v31 }
  0x2c   :  { %492 = vmatpush3.msra.mxu0 %v256_v31  ;;  %537 = vmatpush3.msra.mxu1 %v256_v31 }
  0x2d   :  { %493 = vmatprep.subr.mxu0 %v255_v32  ;;  %522 = vmatprep.subr.mxu1 %v255_v32 }
  0x2e   :  { %494 = vmatpush3.msra.mxu0 %v255_v32  ;;  %538 = vmatpush3.msra.mxu1 %v255_v32 }
  0xca   :  { %v152_v38 = vpop.f32.mrf.mxu0 }
  0xcb   :  { %v153_v39 = vadd.f32 %v152_v38, %v54_v37 }
  0xcc   :  { %v154_v40 = vpop.f32.mrf.mxu0 }
  0xcd   :  { %v207_v41 = vmul.f32 0.70710677, %v153_v39  ;;  %v199_v60 = vmul.f32 0.5, %v153_v39  ;;  %v155_v0 = vadd.f32 %v154_v40, %v702_v56 }
  0xce   :  { %v158_v42 = vpop.f32.mrf.mxu0 }
  0xcf   :  { %540 = verf.f32 %v207_v41  ;;  %v159_v43 = vadd.f32 %v158_v42, %v54_v37 }
  0xd0   :  { %v160_v44 = vpop.f32.mrf.mxu0 }
  0xd1   :  { %v208_v45 = vmul.f32 0.70710677, %v159_v43  ;;  %v200_v6 = vmul.f32 0.5, %v159_v43  ;;  %v161_v10 = vadd.f32 %v160_v44, %v702_v56 }
  0xd2   :  { %v164_v46 = vpop.f32.mrf.mxu0 }
  0xd3   :  { %542 = verf.f32 %v208_v45  ;;  %v165_v47 = vadd.f32 %v164_v46, %v54_v37 }
  0xd4   :  { %v166_v48 = vpop.f32.mrf.mxu0 }
  0xd5   :  { %v209_v49 = vmul.f32 0.70710677, %v165_v47  ;;  %v201_v17 = vmul.f32 0.5, %v165_v47  ;;  %v167_v22 = vadd.f32 %v166_v48, %v702_v56 }
  0xd6   :  { %v170_v50 = vpop.f32.mrf.mxu0 }
  0xd7   :  { %544 = verf.f32 %v209_v49  ;;  %v171_v52 = vadd.f32 %v170_v50, %v54_v37 }
  0xd8   :  { %v172_v53 = vpop.f32.mrf.mxu0 }
  0xd9   :  { %v210_v54 = vmul.f32 0.70710677, %v171_v52  ;;  %v202_v24 = vmul.f32 0.5, %v171_v52  ;;  %v173_v28 = vadd.f32 %v172_v53, %v702_v56 }
  0xda   :  { %v176_v55 = vpop.f32.mrf.mxu0 }
  0xdb   :  { %546 = verf.f32 %v210_v54  ;;  %v177_v57 = vadd.f32 %v176_v55, %v54_v37 }
  0xdc   :  { %v541_v58 = vpop.eup %540  ;;  %v178_v59 = vpop.f32.mrf.mxu0 }
  0xdd   :  { %v223_v61 = vadd.f32 1.0, %v541_v58  ;;  %v211_v62 = vmul.f32 0.70710677, %v177_v57  ;;  %v203_v32 = vmul.f32 0.5, %v177_v57  ;;  %v179_v34 = vadd.f32 %v178_v59, %v702_v56  ;;  %v248_v57 = vld [vmem:[#allocation2 + $0x8] sm:$0xff]  ;;  %v247_v59 = vld [vmem:[#allocation2] sm:$0xff] }
  0xde   :  { %v182_v63 = vpop.f32.mrf.mxu0 }
  0xdf   :  { %v231_v1 = vmul.f32 %v223_v61, %v199_v60  ;;  %548 = verf.f32 %v211_v62  ;;  %v183_v2 = vadd.f32 %v182_v63, %v54_v37  ;;  %v250_v63 = vld [vmem:[#allocation2 + $0x18] sm:$0xff] }
  0xe0   :  { %v543_v3 = vpop.eup %542  ;;  %v184_v4 = vpop.f32.mrf.mxu0 }
  0xe1   :  { %v239_v5 = vmul.f32 %v231_v1, %v155_v0  ;;  %v224_v7 = vadd.f32 1.0, %v543_v3  ;;  %v212_v8 = vmul.f32 0.70710677, %v183_v2  ;;  %v204_v38 = vmul.f32 0.5, %v183_v2  ;;  %v438_v0 = vld [vmem:[%s759_s4] ss:$0 sm:$0xff] }
  0xe2   :  { %v188_v9 = vpop.f32.mrf.mxu0  ;;  %v185_v40 = vadd.f32 %v184_v4, %v702_v56  ;;  %v249_v1 = vld [vmem:[#allocation2 + $0x10] sm:$0xff] }
  0xe3   :  { %v232_v11 = vmul.f32 %v224_v7, %v200_v6  ;;  %550 = verf.f32 %v212_v8  ;;  %v189_v12 = vadd.f32 %v188_v9, %v54_v37  ;;  %495 = vmatprep.mubr.f32.mxu0 %v239_v5  ;;  %v252_v9 = vld [vmem:[#allocation2 + $0x28] sm:$0xff] }
  0xe4   :  { %v545_v13 = vpop.eup %544  ;;  %v190_v14 = vpop.f32.mrf.mxu0 }
  0xe5   :  { %v240_v15 = vmul.f32 %v232_v11, %v161_v10  ;;  %v213_v16 = vmul.f32 0.70710677, %v189_v12  ;;  %v225_v19 = vadd.f32 1.0, %v545_v13  ;;  %v205_v44 = vmul.f32 0.5, %v189_v12  ;;  %v251_v11 = vld [vmem:[#allocation2 + $0x20] sm:$0xff] }
  0xe6   :  { %v194_v18 = vpop.f32.mrf.mxu0  ;;  %v191_v46 = vadd.f32 %v190_v14, %v702_v56 }
  0xe7   :  { %552 = verf.f32 %v213_v16  ;;  %v195_v20 = vadd.f32 %v194_v18, %v54_v37  ;;  %496 = vmatmul.mubr.f32.vlgmr.msra.gmra.mxu0 %v240_v15  ;;  %v233_v23 = vmul.f32 %v225_v19, %v201_v17  ;;  %v254_v19 = vld [vmem:[#allocation2 + $0x38] sm:$0xff] }
  0xe8   :  { %v547_v21 = vpop.eup %546  ;;  %v196_v49 = vpop.f32.mrf.mxu0 }
  0xe9   :  { %v226_v25 = vadd.f32 1.0, %v547_v21  ;;  %v214_v26 = vmul.f32 0.70710677, %v195_v20  ;;  %v241_v27 = vmul.f32 %v233_v23, %v167_v22  ;;  %v206_v51 = vmul.f32 0.5, %v195_v20  ;;  %v253_v21 = vld [vmem:[#allocation2 + $0x30] sm:$0xff] }
  0xea   :  { %v197_v53 = vadd.f32 %v196_v49, %v702_v56 }
  0xeb   :  { %v234_v29 = vmul.f32 %v226_v25, %v202_v24  ;;  %554 = verf.f32 %v214_v26  ;;  %498 = vmatprep.mubr.f32.mxu1 %v241_v27 }
  0xec   :  { %v549_v30 = vpop.eup %548 }
  0xed   :  { %v242_v31 = vmul.f32 %v234_v29, %v173_v28  ;;  %v227_v33 = vadd.f32 1.0, %v549_v30 }
  0xef   :  { %v235_v35 = vmul.f32 %v227_v33, %v203_v32  ;;  %499 = vmatmul.mubr.f32.vlgmr.msra.gmra.mxu1 %v242_v31 }
  0xf0   :  { %v551_v36 = vpop.eup %550 }
  0xf1   :  { %v243_v37 = vmul.f32 %v235_v35, %v179_v34  ;;  %v228_v39 = vadd.f32 1.0, %v551_v36 }
  0xf3   :  { %v236_v41 = vmul.f32 %v228_v39, %v204_v38  ;;  %501 = vmatprep.mubr.f32.mxu1 %v243_v37 }
  0xf4   :  { %v553_v42 = vpop.eup %552 }
  0xf5   :  { %v244_v43 = vmul.f32 %v236_v41, %v185_v40  ;;  %v229_v45 = vadd.f32 1.0, %v553_v42 }
  0xf7   :  { %v237_v47 = vmul.f32 %v229_v45, %v205_v44  ;;  %502 = vmatmul.mubr.f32.gmra.mxu1 %v244_v43 }
  0xf8   :  { %v555_v48 = vpop.eup %554 }
  0xf9   :  { %v245_v50 = vmul.f32 %v237_v47, %v191_v46  ;;  %v230_v52 = vadd.f32 1.0, %v555_v48 }
  0xfb   :  { %v238_v54 = vmul.f32 %v230_v52, %v206_v51  ;;  %504 = vmatprep.mubr.f32.mxu1 %v245_v50 }
  0xfd   :  { %v246_v55 = vmul.f32 %v238_v54, %v197_v53 }
  0xff   :  { %505 = vmatmul.mubr.f32.gmra.mxu1 %v246_v55 }
 0x1a7   :  { %v497_v58 = vpop.f32.mrf.mxu0 }
 0x1a8   :  { %v377_v60 = vadd.f32 %v497_v58, %v248_v57 }
 0x1a9   :  { %v337_v61 = vpop.f32.mrf.mxu0 }
 0x1aa   :  { %385 = vst.msk [vmem:[#allocation2 + $0x8] sm:$0xff] %vm24_vm0, %v377_v60  ;;  %v376_v62 = vadd.f32 %v337_v61, %v247_v59 }
 0x1ac   :  { %384 = vst.msk [vmem:[#allocation2] sm:$0xff] %vm24_vm0, %v376_v62 }
 0x1af   :  { %v500_v56 = vpop.f32.mrf.mxu1 }
 0x1b0   :  { %v379_v2 = vadd.f32 %v500_v56, %v250_v63 }
 0x1b1   :  { %v396_v3 = vld [vmem:[#allocation2 + $0x8] sm:$0xff]  ;;  %v347_v4 = vpop.f32.mrf.mxu1 }
 0x1b2   :  { %v411_v5 = vadd.f32 %v438_v0, %v396_v3  ;;  %387 = vst.msk [vmem:[#allocation2 + $0x18] sm:$0xff] %vm24_vm0, %v379_v2  ;;  %v378_v6 = vadd.f32 %v347_v4, %v249_v1 }
 0x1b3   :  { %v395_v7 = vld [vmem:[#allocation2] sm:$0xff] }
 0x1b4   :  { %419 = vst.msk [vmem:[%s760_s5 + $0x8] sm:$0xff] %vm24_vm0, %v411_v5  ;;  %v410_v8 = vadd.f32 %v438_v0, %v395_v7  ;;  %386 = vst.msk [vmem:[#allocation2 + $0x10] sm:$0xff] %vm24_vm0, %v378_v6 }
 0x1b6   :  { %418 = vst.msk [vmem:[%s760_s5] sm:$0xff] %vm24_vm0, %v410_v8 }
 0x1b7   :  { %v503_v10 = vpop.f32.mrf.mxu1 }
 0x1b8   :  { %v381_v12 = vadd.f32 %v503_v10, %v252_v9 }
 0x1b9   :  { %v398_v13 = vld [vmem:[#allocation2 + $0x18] sm:$0xff]  ;;  %v357_v14 = vpop.f32.mrf.mxu1 }
 0x1ba   :  { %v413_v15 = vadd.f32 %v438_v0, %v398_v13  ;;  %389 = vst.msk [vmem:[#allocation2 + $0x28] sm:$0xff] %vm24_vm0, %v381_v12  ;;  %v380_v16 = vadd.f32 %v357_v14, %v251_v11 }
 0x1bb   :  { %v397_v17 = vld [vmem:[#allocation2 + $0x10] sm:$0xff] }
 0x1bc   :  { %421 = vst.msk [vmem:[%s760_s5 + $0x18] sm:$0xff] %vm24_vm0, %v413_v15  ;;  %v412_v18 = vadd.f32 %v438_v0, %v397_v17  ;;  %388 = vst.msk [vmem:[#allocation2 + $0x20] sm:$0xff] %vm24_vm0, %v380_v16 }
 0x1be   :  { %420 = vst.msk [vmem:[%s760_s5 + $0x10] sm:$0xff] %vm24_vm0, %v412_v18 }
 0x1bf   :  { %v506_v20 = vpop.f32.mrf.mxu1 }
 0x1c0   :  { %v383_v22 = vadd.f32 %v506_v20, %v254_v19 }
 0x1c1   :  { %v400_v23 = vld [vmem:[#allocation2 + $0x28] sm:$0xff]  ;;  %v367_v24 = vpop.f32.mrf.mxu1 }
 0x1c2   :  { %v415_v25 = vadd.f32 %v438_v0, %v400_v23  ;;  %391 = vst.msk [vmem:[#allocation2 + $0x38] sm:$0xff] %vm24_vm0, %v383_v22  ;;  %v382_v26 = vadd.f32 %v367_v24, %v253_v21 }
 0x1c3   :  { %v399_v27 = vld [vmem:[#allocation2 + $0x20] sm:$0xff] }
 0x1c4   :  { %423 = vst.msk [vmem:[%s760_s5 + $0x28] sm:$0xff] %vm24_vm0, %v415_v25  ;;  %v414_v28 = vadd.f32 %v438_v0, %v399_v27  ;;  %390 = vst.msk [vmem:[#allocation2 + $0x30] sm:$0xff] %vm24_vm0, %v382_v26 }
 0x1c6   :  { %422 = vst.msk [vmem:[%s760_s5 + $0x20] sm:$0xff] %vm24_vm0, %v414_v28 }
 0x1c9   :  { %v402_v29 = vld [vmem:[#allocation2 + $0x38] sm:$0xff] }
 0x1ca   :  { %v417_v30 = vadd.f32 %v438_v0, %v402_v29 }
 0x1cb   :  { %v401_v31 = vld [vmem:[#allocation2 + $0x30] sm:$0xff] }
 0x1cc   :  { %425 = vst.msk [vmem:[%s760_s5 + $0x38] sm:$0xff] %vm24_vm0, %v417_v30  ;;  %v416_v32 = vadd.f32 %v438_v0, %v401_v31 }
 0x1ce   :  { %424 = vst.msk [vmem:[%s760_s5 + $0x30] sm:$0xff] %vm24_vm0, %v416_v32 }

</bundles_post_ra>
